<compile_context>
chip_gen: v6e
topology: v6e:2x2x1
jax: 0.10.0
libtpu: 0.0.40
codegen_flags: <defaults>
</compile_context>

<pallas_src>
import functools

import jax
import jax.numpy as jnp
from jax.experimental import pallas as pl
from jax.experimental.pallas import tpu as pltpu

HIDDEN = 256
OUT_PAD = 128  # lane-dense padded output width (assumes action_dim <= 128)


def actor_kernel(x_ref, w1_ref, b1_ref, w2_ref, b2_ref, w3_ref, b3_ref, o_ref):
    # x tile: [TB, S] bf16.  Weights: bf16 [in, out].  Biases: f32 [1, out].
    x = x_ref[...]

    # Layer 1: Linear(S, 256) + ReLU  (bf16 MXU operands, f32 accumulate)
    h1 = jnp.dot(x, w1_ref[...], preferred_element_type=jnp.float32)
    h1 = jnp.maximum(h1 + b1_ref[...], 0.0)

    # Layer 2: Linear(256, 256) + ReLU
    h2 = jnp.dot(h1.astype(jnp.bfloat16), w2_ref[...],
                 preferred_element_type=jnp.float32)
    h2 = jnp.maximum(h2 + b2_ref[...], 0.0)

    # Layer 3: Linear(256, OUT_PAD) + tanh  (lane-dense padded output tile)
    h3 = jnp.dot(h2.astype(jnp.bfloat16), w3_ref[...],
                 preferred_element_type=jnp.float32)
    o_ref[...] = jnp.tanh(h3 + b3_ref[...]).astype(o_ref.dtype)


@functools.partial(jax.jit, static_argnames=("action_dim", "tb"))
def actor_forward(state, params, *, action_dim, tb=256):
    """state: [B, state_dim] f32 -> [B, action_dim] f32."""
    B, S = state.shape

    # Pad batch to a multiple of the row tile (zero rows, dropped at the end).
    n_tiles = pl.cdiv(B, tb)
    Bp = n_tiles * tb
    if Bp != B:
        state = jnp.pad(state, ((0, Bp - B), (0, 0)))

    # bf16 streamed input: same rounding the first MXU dot would apply anyway,
    # but halves the HBM bytes for the only per-tile streamed input.
    state_bf16 = state.astype(jnp.bfloat16)

    flops = 2 * Bp * (S * HIDDEN + HIDDEN * HIDDEN + HIDDEN * OUT_PAD)
    bytes_accessed = (
        Bp * S * 2                                                  # x (bf16)
        + (S * HIDDEN + HIDDEN * HIDDEN + HIDDEN * OUT_PAD) * 2     # W (bf16)
        + (HIDDEN + HIDDEN + OUT_PAD) * 4                           # biases
        + Bp * OUT_PAD * 4                                          # out (f32)
    )

    out = pl.pallas_call(
        actor_kernel,
        out_shape=jax.ShapeDtypeStruct((Bp, OUT_PAD), jnp.float32),
        grid=(n_tiles,),
        in_specs=[
            pl.BlockSpec((tb, S), lambda i: (i, 0)),            # x: streamed rows
            pl.BlockSpec((S, HIDDEN), lambda i: (0, 0)),        # w1: VMEM resident
            pl.BlockSpec((1, HIDDEN), lambda i: (0, 0)),        # b1
            pl.BlockSpec((HIDDEN, HIDDEN), lambda i: (0, 0)),   # w2
            pl.BlockSpec((1, HIDDEN), lambda i: (0, 0)),        # b2
            pl.BlockSpec((HIDDEN, OUT_PAD), lambda i: (0, 0)),  # w3 (lane-padded)
            pl.BlockSpec((1, OUT_PAD), lambda i: (0, 0)),       # b3 (lane-padded)
        ],
        out_specs=pl.BlockSpec((tb, OUT_PAD), lambda i: (i, 0)),
        compiler_params=pltpu.CompilerParams(
            dimension_semantics=("parallel",),          # shard tiles across TCs (v7x)
            vmem_limit_bytes=32 * 1024 * 1024,          # explicit budget, safe on v7x
        ),
        cost_estimate=pl.CostEstimate(
            flops=flops,
            transcendentals=Bp * OUT_PAD,
            bytes_accessed=bytes_accessed,
        ),
    )(
        state_bf16,
        params["w1"], params["b1"],
        params["w2"], params["b2"],
        params["w3"], params["b3"],
    )
    return out[:B, :action_dim]


def init_actor_params(state_dim, action_dim, hidden=HIDDEN, seed=0):
    """PyTorch-style Linear init. Weights stored [in, out] in bf16 (MXU
    operands); biases kept f32. Final layer padded to OUT_PAD lanes."""
    key = jax.random.PRNGKey(seed)
    keys = jax.random.split(key, 6)

    def linear_init(kw, kb, fan_in, fan_out, pad_out=None):
        bound = 1.0 / float(fan_in) ** 0.5
        w = jax.random.uniform(kw, (fan_in, fan_out), jnp.float32, -bound, bound)
        b = jax.random.uniform(kb, (1, fan_out), jnp.float32, -bound, bound)
        if pad_out is not None and pad_out > fan_out:
            w = jnp.pad(w, ((0, 0), (0, pad_out - fan_out)))
            b = jnp.pad(b, ((0, 0), (0, pad_out - fan_out)))
        return w.astype(jnp.bfloat16), b

    w1, b1 = linear_init(keys[0], keys[1], state_dim, hidden)
    w2, b2 = linear_init(keys[2], keys[3], hidden, hidden)
    w3, b3 = linear_init(keys[4], keys[5], hidden, action_dim, pad_out=OUT_PAD)
    return {"w1": w1, "b1": b1, "w2": w2, "b2": b2, "w3": w3, "b3": b3}


def actor_reference(state, p, action_dim):
    """Pure-JAX f32 reference (same bf16-rounded weights, f32 math)."""
    w1 = p["w1"].astype(jnp.float32)
    w2 = p["w2"].astype(jnp.float32)
    w3 = p["w3"].astype(jnp.float32)
    h = jnp.maximum(state @ w1 + p["b1"], 0.0)
    h = jnp.maximum(h @ w2 + p["b2"], 0.0)
    out = jnp.tanh(h @ w3 + p["b3"])
    return out[:, :action_dim]


if __name__ == "__main__":
    # Batched actor evaluation: B=384 pads to 512 -> 2 grid steps of 256 rows,
    # exercising the batch-tiled pipeline and the pad/slice paths.
    B, state_dim, action_dim = 384, 32, 8

    key = jax.random.PRNGKey(0)
    state = jax.random.normal(key, (B, state_dim), dtype=jnp.float32)
    params = init_actor_params(state_dim, action_dim, seed=0)

    out = actor_forward(state, params, action_dim=action_dim, tb=256)
    out = jax.block_until_ready(out)

    ref = actor_reference(state, params, action_dim)
    assert out.shape == (B, action_dim), out.shape
    # bf16 MXU operands / bf16 streamed activations -> relaxed tolerance
    # vs. the f32 reference.
    max_err = float(jnp.max(jnp.abs(out - ref)))
    assert jnp.allclose(out, ref, atol=3e-2, rtol=3e-2), f"max err {max_err}"

    print("KERNEL_OK")
</pallas_src>

<mosaic_0001>
module attributes {stable_mosaic.version = 11 : i64} {
  func.func @actor_kernel(%arg0: i32, %arg1: memref<256x32xbf16, #tpu.memory_space<vmem>>, %arg2: memref<32x256xbf16, #tpu.memory_space<vmem>>, %arg3: memref<1x256xf32, #tpu.memory_space<vmem>>, %arg4: memref<256x256xbf16, #tpu.memory_space<vmem>>, %arg5: memref<1x256xf32, #tpu.memory_space<vmem>>, %arg6: memref<256x128xbf16, #tpu.memory_space<vmem>>, %arg7: memref<1x128xf32, #tpu.memory_space<vmem>>, %arg8: memref<256x128xf32, #tpu.memory_space<vmem>>) attributes {dimension_semantics = [#tpu.dimension_semantics<parallel>], iteration_bounds = array<i64: 2>, scalar_prefetch = 0 : i64, scratch_operands = 0 : i64, tpu.core_type = #tpu.core_type<tc>, window_params = [{transform_indices = @transform_0, window_bounds = array<i64: 256, 32>}, {pipeline_mode = #tpu.pipeline_mode<synchronous>, transform_indices = @transform_1, window_bounds = array<i64: 32, 256>}, {pipeline_mode = #tpu.pipeline_mode<synchronous>, transform_indices = @transform_2, window_bounds = array<i64: 1, 256>}, {pipeline_mode = #tpu.pipeline_mode<synchronous>, transform_indices = @transform_3, window_bounds = array<i64: 256, 256>}, {pipeline_mode = #tpu.pipeline_mode<synchronous>, transform_indices = @transform_4, window_bounds = array<i64: 1, 256>}, {pipeline_mode = #tpu.pipeline_mode<synchronous>, transform_indices = @transform_5, window_bounds = array<i64: 256, 128>}, {pipeline_mode = #tpu.pipeline_mode<synchronous>, transform_indices = @transform_6, window_bounds = array<i64: 1, 128>}, {transform_indices = @transform_7, window_bounds = array<i64: 256, 128>}]} {
    %c0 = arith.constant 0 : index
    %c0_0 = arith.constant 0 : index
    %0 = vector.load %arg1[%c0, %c0_0] : memref<256x32xbf16, #tpu.memory_space<vmem>>, vector<256x32xbf16>
    %c0_1 = arith.constant 0 : index
    %c0_2 = arith.constant 0 : index
    %1 = vector.load %arg2[%c0_1, %c0_2] : memref<32x256xbf16, #tpu.memory_space<vmem>>, vector<32x256xbf16>
    %cst = arith.constant dense<0.000000e+00> : vector<256x256xf32>
    %2 = tpu.matmul %0, %1, %cst {dimension_numbers = #tpu.dot_dimension_numbers<[1], [0], [0], [1], [0, 0, 1, 1], [], []>} : vector<256x32xbf16>, vector<32x256xbf16>, vector<256x256xf32> -> vector<256x256xf32>
    %c0_3 = arith.constant 0 : index
    %c0_4 = arith.constant 0 : index
    %3 = vector.load %arg3[%c0_3, %c0_4] : memref<1x256xf32, #tpu.memory_space<vmem>>, vector<1x256xf32>
    %4 = vector.broadcast %3 : vector<1x256xf32> to vector<256x256xf32>
    %5 = arith.addf %2, %4 : vector<256x256xf32>
    %cst_5 = arith.constant 0.000000e+00 : f32
    %6 = vector.broadcast %cst_5 : f32 to vector<256x256xf32>
    %7 = arith.maximumf %5, %6 : vector<256x256xf32>
    %8 = arith.truncf %7 : vector<256x256xf32> to vector<256x256xbf16>
    %c0_6 = arith.constant 0 : index
    %c0_7 = arith.constant 0 : index
    %9 = vector.load %arg4[%c0_6, %c0_7] : memref<256x256xbf16, #tpu.memory_space<vmem>>, vector<256x256xbf16>
    %cst_8 = arith.constant dense<0.000000e+00> : vector<256x256xf32>
    %10 = tpu.matmul %8, %9, %cst_8 {dimension_numbers = #tpu.dot_dimension_numbers<[1], [0], [0], [1], [0, 0, 1, 1], [], []>} : vector<256x256xbf16>, vector<256x256xbf16>, vector<256x256xf32> -> vector<256x256xf32>
    %c0_9 = arith.constant 0 : index
    %c0_10 = arith.constant 0 : index
    %11 = vector.load %arg5[%c0_9, %c0_10] : memref<1x256xf32, #tpu.memory_space<vmem>>, vector<1x256xf32>
    %12 = vector.broadcast %11 : vector<1x256xf32> to vector<256x256xf32>
    %13 = arith.addf %10, %12 : vector<256x256xf32>
    %cst_11 = arith.constant 0.000000e+00 : f32
    %14 = vector.broadcast %cst_11 : f32 to vector<256x256xf32>
    %15 = arith.maximumf %13, %14 : vector<256x256xf32>
    %16 = arith.truncf %15 : vector<256x256xf32> to vector<256x256xbf16>
    %c0_12 = arith.constant 0 : index
    %c0_13 = arith.constant 0 : index
    %17 = vector.load %arg6[%c0_12, %c0_13] : memref<256x128xbf16, #tpu.memory_space<vmem>>, vector<256x128xbf16>
    %cst_14 = arith.constant dense<0.000000e+00> : vector<256x128xf32>
    %18 = tpu.matmul %16, %17, %cst_14 {dimension_numbers = #tpu.dot_dimension_numbers<[1], [0], [0], [1], [0, 0, 1, 1], [], []>} : vector<256x256xbf16>, vector<256x128xbf16>, vector<256x128xf32> -> vector<256x128xf32>
    %c0_15 = arith.constant 0 : index
    %c0_16 = arith.constant 0 : index
    %19 = vector.load %arg7[%c0_15, %c0_16] : memref<1x128xf32, #tpu.memory_space<vmem>>, vector<1x128xf32>
    %20 = vector.broadcast %19 : vector<1x128xf32> to vector<256x128xf32>
    %21 = arith.addf %18, %20 : vector<256x128xf32>
    %22 = math.tanh %21 : vector<256x128xf32>
    %c0_17 = arith.constant 0 : index
    %c0_18 = arith.constant 0 : index
    %23 = vector.load %arg8[%c0_17, %c0_18] : memref<256x128xf32, #tpu.memory_space<vmem>>, vector<256x128xf32>
    tpu.vector_store %arg8[%c0_17, %c0_18], %22 {strides = array<i32>} : memref<256x128xf32, #tpu.memory_space<vmem>>, vector<256x128xf32>,
    return
  }
  func.func @transform_0(%arg0: i32) -> (i32, i32) {
    %c0_i32 = arith.constant 0 : i32
    %c0_i32_0 = arith.constant 0 : i32
    return %arg0, %c0_i32 : i32, i32
  }
  func.func @transform_1(%arg0: i32) -> (i32, i32) {
    %c0_i32 = arith.constant 0 : i32
    %c0_i32_0 = arith.constant 0 : i32
    %c0_i32_1 = arith.constant 0 : i32
    return %c0_i32, %c0_i32_0 : i32, i32
  }
  func.func @transform_2(%arg0: i32) -> (i32, i32) {
    %c0_i32 = arith.constant 0 : i32
    %c0_i32_0 = arith.constant 0 : i32
    %c0_i32_1 = arith.constant 0 : i32
    return %c0_i32, %c0_i32_0 : i32, i32
  }
  func.func @transform_3(%arg0: i32) -> (i32, i32) {
    %c0_i32 = arith.constant 0 : i32
    %c0_i32_0 = arith.constant 0 : i32
    %c0_i32_1 = arith.constant 0 : i32
    return %c0_i32, %c0_i32_0 : i32, i32
  }
  func.func @transform_4(%arg0: i32) -> (i32, i32) {
    %c0_i32 = arith.constant 0 : i32
    %c0_i32_0 = arith.constant 0 : i32
    %c0_i32_1 = arith.constant 0 : i32
    return %c0_i32, %c0_i32_0 : i32, i32
  }
  func.func @transform_5(%arg0: i32) -> (i32, i32) {
    %c0_i32 = arith.constant 0 : i32
    %c0_i32_0 = arith.constant 0 : i32
    %c0_i32_1 = arith.constant 0 : i32
    return %c0_i32, %c0_i32_0 : i32, i32
  }
  func.func @transform_6(%arg0: i32) -> (i32, i32) {
    %c0_i32 = arith.constant 0 : i32
    %c0_i32_0 = arith.constant 0 : i32
    %c0_i32_1 = arith.constant 0 : i32
    return %c0_i32, %c0_i32_0 : i32, i32
  }
  func.func @transform_7(%arg0: i32) -> (i32, i32) {
    %c0_i32 = arith.constant 0 : i32
    %c0_i32_0 = arith.constant 0 : i32
    return %arg0, %c0_i32 : i32, i32
  }
}

</mosaic_0001>

<bundles_post_ra>
// kernel: actor_forward.1
= control target key start
LH: loop header
LB: loop body
LE: loop exit
PB: predicated region body
PF: predicated region fallthrough
CT: control target
= control target key end

     0   :  { %s2098_s24 = smov 0   ;;  %s2610_s0 = inlined_call_operand.vmem [shape: bf16[512,32], index: 0, kind: input, shape index: {}]   ;;  %s2611_s1 = inlined_call_operand.vmem [shape: bf16[32,256], index: 1, kind: input, shape index: {}]   ;;  %s2612_s2 = inlined_call_operand.vmem [shape: f32[1,256], index: 2, kind: input, shape index: {}]   ;;  %s2613_s3 = inlined_call_operand.vmem [shape: bf16[256,256], index: 3, kind: input, shape index: {}]   ;;  %s2614_s4 = inlined_call_operand.vmem [shape: f32[1,256], index: 4, kind: input, shape index: {}]   ;;  %s2615_s5 = inlined_call_operand.vmem [shape: bf16[256,128], index: 5, kind: input, shape index: {}]   ;;  %s2616_s6 = inlined_call_operand.vmem [shape: f32[1,128], index: 6, kind: input, shape index: {}]   ;;  %s2617_s7 = inlined_call_operand.vmem [shape: f32[512,128], index: 7, kind: output, shape index: {}]  }
   0x1 LB: > { %s1678_s25 = sadd.s32 4294967295, %s2055_s24   ;;  %p1682_p0 = scmp.ge.s32.totalorder %s2055_s24, 1  ;;  %s2055_s24 = sphi %s2098_s24, %s17_s24  }
   0x2   : > { %p238_p1 = scmp.lt.s32.totalorder %s2055_s24, 3 }
   0x4   : > { %p239_p2 = pnand %p1682_p0, %p238_p1 }
   0x5   : > { %s1683_s28 = sshll.u32 (!%p239_p2), %s1678_s25, 5 }
   0x6   : > { %242 = sbr.rel (%p239_p2) target bundleno = 771 (0x303), region = 48  ;;  %p271_p3 = scmp.lt.s32.totalorder (!%p239_p2), %s1683_s28, 63 }
   0xb   : > { %v1899_v0 = vld [vmem:[%s2611_s1 + $0x14] ss:$8 sps:$4 sm:$0xff]   ;;  %v1901_v1 = vld [vmem:[%s2611_s1 + $0x10] ss:$8 sps:$4 sm:$0xff]   ;;  %v2057_v2 = vmov 0   ;;  %s2619_s28 = smov (!%p271_p3, %s1683_s28), 63  ;;  %v321_v53 = vlaneseq }
   0xc   : > { %512 = vmatprep.mubr.bf16.mxu0 %v2057_v2  ;;  %592 = vmatprep.mubr.bf16.mxu1 %v2057_v2  ;;  %v1902_v3 = vld [vmem:[%s2611_s1 + $0x4] ss:$8 sps:$4 sm:$0xff]   ;;  %v1904_v4 = vld [vmem:[%s2611_s1] ss:$8 sps:$4 sm:$0xff]   ;;  %v1923_v5 = vld [vmem:[%s2613_s3 + $0x74] ss:$8 sps:$4 sm:$0xff]  }
   0xd   : > { %492 = vmatprep.subr.bf16.mxu0 %v1899_v0  ;;  %1886 = vmatprep.subr.bf16.mxu1 %v1899_v0  ;;  %s1684_s14 = sshll.u32 %s2619_s28, 2  ;;  %vm431_vm0 = vcmask 261120   ;;  %v1921_v7 = vld [vmem:[%s2613_s3 + $0x70] ss:$8 sps:$4 sm:$0xff]   ;;  %v1926_v10 = vld [vmem:[%s2613_s3 + $0x64] ss:$8 sps:$4 sm:$0xff]  }
   0xe   : > { %493 = vmatpush1.bf16.msra.mxu0 %v1901_v1  ;;  %1888 = vmatpush1.bf16.msra.mxu1 %v1901_v1  ;;  %s2129_s17 = scalar_lea.vmem %s2610_s0, %s1684_s14  ;;  %v1924_v11 = vld [vmem:[%s2613_s3 + $0x60] ss:$8 sps:$4 sm:$0xff]   ;;  %v1929_v12 = vld [vmem:[%s2613_s3 + $0x54] ss:$8 sps:$4 sm:$0xff]   ;;  %v1927_v15 = vld [vmem:[%s2613_s3 + $0x50] ss:$8 sps:$4 sm:$0xff]  }
   0xf   : > { %494 = vmatprep.subr.bf16.mxu0 %v1902_v3  ;;  %1887 = vmatprep.subr.bf16.mxu1 %v1902_v3  ;;  %v1905_v6 = vld [vmem:[%s2129_s17] sm:$0xff]   ;;  %v1906_v8 = vld [vmem:[%s2129_s17 + $0x8] sm:$0xff]   ;;  %v1907_v14 = vld [vmem:[%s2129_s17 + $0x10] sm:$0xff]   ;;  %v2270_v54 = vshrl.u32 %v321_v53, 7 }
  0x10   : > { %v1913_v9 = vld [vmem:[%s2129_s17 + $0x40] sm:$0xff]   ;;  %v1914_v13 = vld [vmem:[%s2129_s17 + $0x48] sm:$0xff]   ;;  %v1935_v18 = vld [vmem:[%s2613_s3 + $0x34] ss:$8 sps:$4 sm:$0xff]  }
  0x11   : > { %v1932_v16 = vld [vmem:[%s2613_s3 + $0x44] ss:$8 sps:$4 sm:$0xff]   ;;  %v1930_v17 = vld [vmem:[%s2613_s3 + $0x40] ss:$8 sps:$4 sm:$0xff]   ;;  %v1915_v19 = vld [vmem:[%s2129_s17 + $0x50] sm:$0xff]   ;;  %v327_v55 = vsub.s32 1, %v2270_v54 }
  0x12   : > { %495 = vmatpush1.bf16.msra.mxu0 %v1904_v4  ;;  %1889 = vmatpush1.bf16.msra.mxu1 %v1904_v4  ;;  %v1908_v20 = vld [vmem:[%s2129_s17 + $0x18] sm:$0xff]   ;;  %v1938_v22 = vld [vmem:[%s2613_s3 + $0x24] ss:$8 sps:$4 sm:$0xff]   ;;  %v1936_v24 = vld [vmem:[%s2613_s3 + $0x20] ss:$8 sps:$4 sm:$0xff]   ;;  %v323_v56 = vsub.s32 0, %v2270_v54 }
  0x13   : > { %973 = vmatprep.subr.bf16.mxu1 %v1923_v5  ;;  %v1933_v21 = vld [vmem:[%s2613_s3 + $0x30] ss:$8 sps:$4 sm:$0xff]   ;;  %v1909_v25 = vld [vmem:[%s2129_s17 + $0x20] sm:$0xff]   ;;  %v1941_v26 = vld [vmem:[%s2613_s3 + $0x14] ss:$8 sps:$4 sm:$0xff]  }
  0x14   : > { %v1916_v23 = vld [vmem:[%s2129_s17 + $0x58] sm:$0xff]   ;;  %v1944_v28 = vld [vmem:[%s2613_s3 + $0x4] ss:$8 sps:$4 sm:$0xff]   ;;  %v1942_v29 = vld [vmem:[%s2613_s3] ss:$8 sps:$4 sm:$0xff]  }
  0x15   : > { %1707 = vmatmul.mubr.msk.bf16.vlgmr.msra.gmra.mxu0 %vm431_vm0, %v1905_v6  ;;  %1715 = vmatmul.mubr.msk.bf16.vlgmr.msra.gmra.mxu1 %vm431_vm0, %v1913_v9  ;;  %v1939_v27 = vld [vmem:[%s2613_s3 + $0x10] ss:$8 sps:$4 sm:$0xff]   ;;  %v1947_v30 = vld [vmem:[%s2613_s3 + $0xf4] ss:$8 sps:$4 sm:$0xff]   ;;  %v1917_v31 = vld [vmem:[%s2129_s17 + $0x60] sm:$0xff]  }
  0x16   : > { %522 = vmatprep.mubr.bf16.mxu0 %v2057_v2  ;;  %602 = vmatprep.mubr.bf16.mxu1 %v2057_v2  ;;  %v1910_v32 = vld [vmem:[%s2129_s17 + $0x28] sm:$0xff]   ;;  %v1945_v33 = vld [vmem:[%s2613_s3 + $0xf0] ss:$8 sps:$4 sm:$0xff]   ;;  %v1953_v36 = vld [vmem:[%s2613_s3 + $0xd4] ss:$8 sps:$4 sm:$0xff]  }
  0x17   : > { %974 = vmatpush1.bf16.msra.mxu1 %v1921_v7  ;;  %v1950_v34 = vld [vmem:[%s2613_s3 + $0xe4] ss:$8 sps:$4 sm:$0xff]   ;;  %v1948_v35 = vld [vmem:[%s2613_s3 + $0xe0] ss:$8 sps:$4 sm:$0xff]   ;;  %v1911_v38 = vld [vmem:[%s2129_s17 + $0x30] sm:$0xff]  }
  0x18   : > { %975 = vmatprep.subr.bf16.mxu1 %v1926_v10  ;;  %v1918_v37 = vld [vmem:[%s2129_s17 + $0x68] sm:$0xff]   ;;  %v1951_v39 = vld [vmem:[%s2613_s3 + $0xd0] ss:$8 sps:$4 sm:$0xff]   ;;  %v1959_v42 = vld [vmem:[%s2613_s3 + $0xb4] ss:$8 sps:$4 sm:$0xff]  }
  0x19   : > { %v1956_v40 = vld [vmem:[%s2613_s3 + $0xc4] ss:$8 sps:$4 sm:$0xff]   ;;  %v1954_v41 = vld [vmem:[%s2613_s3 + $0xc0] ss:$8 sps:$4 sm:$0xff]   ;;  %v1919_v43 = vld [vmem:[%s2129_s17 + $0x70] sm:$0xff]  }
  0x1a   : > { %v1912_v44 = vld [vmem:[%s2129_s17 + $0x38] sm:$0xff]   ;;  %v1962_v47 = vld [vmem:[%s2613_s3 + $0xa4] ss:$8 sps:$4 sm:$0xff]   ;;  %v1960_v48 = vld [vmem:[%s2613_s3 + $0xa0] ss:$8 sps:$4 sm:$0xff]  }
  0x1b   : > { %976 = vmatpush1.bf16.msra.mxu1 %v1924_v11  ;;  %v1957_v45 = vld [vmem:[%s2613_s3 + $0xb0] ss:$8 sps:$4 sm:$0xff]   ;;  %v1965_v49 = vld [vmem:[%s2613_s3 + $0x94] ss:$8 sps:$4 sm:$0xff]   ;;  %v1968_v51 = vld [vmem:[%s2613_s3 + $0x84] ss:$8 sps:$4 sm:$0xff]  }
  0x1c   : > { %977 = vmatprep.subr.bf16.mxu1 %v1929_v12  ;;  %v1920_v46 = vld [vmem:[%s2129_s17 + $0x78] sm:$0xff]   ;;  %v1966_v52 = vld [vmem:[%s2613_s3 + $0x80] ss:$8 sps:$4 sm:$0xff]   ;;  %v1971_v5 = vld [vmem:[%s2615_s5 + $0x70] sm:$0xff]   ;;  %s1686_s17 = sshll.u32 %s2619_s28, 3 }
  0x1d   : > { %1708 = vmatmul.mubr.msk.bf16.gmra.mxu0 %vm431_vm0, %v1906_v8  ;;  %1716 = vmatmul.mubr.msk.bf16.gmra.mxu1 %vm431_vm0, %v1914_v13  ;;  %v1963_v50 = vld [vmem:[%s2613_s3 + $0x90] ss:$8 sps:$4 sm:$0xff]   ;;  %v319_v57 = vld [vmem:[%s2612_s2] sm:$0x3]  ;;  %s2545_s18 = scalar_lea.vmem %s2617_s7, %s1686_s17 }
  0x1e   : > { %532 = vmatprep.mubr.bf16.mxu0 %v2057_v2  ;;  %612 = vmatprep.mubr.bf16.mxu1 %v2057_v2  ;;  %v2279_v59 = vrot.slane %v319_v57, %v327_v55  ;;  %v2283_v60 = vrot.slane %v319_v57, %v323_v56  ;;  %v1969_v3 = vld [vmem:[%s2615_s5 + $0x78] sm:$0xff]   ;;  %v1972_v13 = vld [vmem:[%s2615_s5 + $0x30] sm:$0xff]  }
  0x1f   : > { %978 = vmatpush1.bf16.msra.mxu1 %v1927_v15  ;;  %v1970_v4 = vld [vmem:[%s2615_s5 + $0x38] sm:$0xff]   ;;  %1774 = vmatprep.subr.bf16.mxu0 %v1969_v3 }
  0x20   : > { %979 = vmatprep.subr.bf16.mxu1 %v1932_v16  ;;  %1775 = vmatpush3.bf16.msra.mxu0 %v1970_v4  ;;  %v1973_v16 = vld [vmem:[%s2615_s5 + $0x68] sm:$0xff]  }
  0x21   : > { %1776 = vmatprep.subr.bf16.mxu0 %v1971_v5 }
  0x23   : > { %980 = vmatpush1.bf16.msra.mxu1 %v1930_v17 }
  0x24   : > { %981 = vmatprep.subr.bf16.mxu1 %v1935_v18  ;;  %1777 = vmatpush3.bf16.msra.mxu0 %v1972_v13 }
  0x25   : > { %1709 = vmatmul.mubr.msk.bf16.gmra.mxu0 %vm431_vm0, %v1907_v14  ;;  %1717 = vmatmul.mubr.msk.bf16.gmra.mxu1 %vm431_vm0, %v1915_v19 }
  0x26   : > { %542 = vmatprep.mubr.bf16.mxu0 %v2057_v2  ;;  %622 = vmatprep.mubr.bf16.mxu1 %v2057_v2 }
  0x27   : > { %982 = vmatpush1.bf16.msra.mxu1 %v1933_v21  ;;  %1778 = vmatprep.subr.bf16.mxu0 %v1973_v16 }
  0x28   : > { %983 = vmatprep.subr.bf16.mxu1 %v1938_v22 }
  0x2b   : > { %984 = vmatpush1.bf16.msra.mxu1 %v1936_v24  ;;  %v1974_v24 = vld [vmem:[%s2615_s5 + $0x28] sm:$0xff]  }
  0x2c   : > { %985 = vmatprep.subr.bf16.mxu1 %v1941_v26  ;;  %1779 = vmatpush3.bf16.msra.mxu0 %v1974_v24 }
  0x2d   : > { %1710 = vmatmul.mubr.msk.bf16.gmra.mxu0 %vm431_vm0, %v1908_v20  ;;  %1718 = vmatmul.mubr.msk.bf16.gmra.mxu1 %vm431_vm0, %v1916_v23 }
  0x2e   : > { %552 = vmatprep.mubr.bf16.mxu0 %v2057_v2  ;;  %632 = vmatprep.mubr.bf16.mxu1 %v2057_v2 }
  0x2f   : > { %986 = vmatpush1.bf16.msra.mxu1 %v1939_v27  ;;  %v1975_v27 = vld [vmem:[%s2615_s5 + $0x60] sm:$0xff]  }
  0x30   : > { %987 = vmatprep.subr.bf16.mxu1 %v1944_v28  ;;  %1780 = vmatprep.subr.bf16.mxu0 %v1975_v27 }
  0x33   : > { %988 = vmatpush1.bf16.msra.mxu1 %v1942_v29 }
  0x34   : > { %989 = vmatprep.subr.bf16.mxu1 %v1947_v30 }
  0x35   : > { %1711 = vmatmul.mubr.msk.bf16.gmra.mxu0 %vm431_vm0, %v1909_v25  ;;  %1719 = vmatmul.mubr.msk.bf16.gmra.mxu1 %vm431_vm0, %v1917_v31 }
  0x36   : > { %562 = vmatprep.mubr.bf16.mxu0 %v2057_v2  ;;  %642 = vmatprep.mubr.bf16.mxu1 %v2057_v2 }
  0x37   : > { %990 = vmatpush2.bf16.msra.mxu1 %v1945_v33 }
  0x38   : > { %991 = vmatprep.subr.bf16.mxu1 %v1950_v34 }
  0x3b   : > { %992 = vmatpush2.bf16.msra.mxu1 %v1948_v35  ;;  %v1976_v35 = vld [vmem:[%s2615_s5 + $0x20] sm:$0xff]  }
  0x3c   : > { %993 = vmatprep.subr.bf16.mxu1 %v1953_v36  ;;  %1781 = vmatpush3.bf16.msra.mxu0 %v1976_v35 }
  0x3d   : > { %1712 = vmatmul.mubr.msk.bf16.gmra.mxu0 %vm431_vm0, %v1910_v32  ;;  %1720 = vmatmul.mubr.msk.bf16.gmra.mxu1 %vm431_vm0, %v1918_v37 }
  0x3e   : > { %572 = vmatprep.mubr.bf16.mxu0 %v2057_v2  ;;  %652 = vmatprep.mubr.bf16.mxu1 %v2057_v2 }
  0x3f   : > { %994 = vmatpush2.bf16.msra.mxu1 %v1951_v39 }
  0x40   : > { %995 = vmatprep.subr.bf16.mxu1 %v1956_v40 }
  0x43   : > { %996 = vmatpush2.bf16.msra.mxu1 %v1954_v41 }
  0x44   : > { %997 = vmatprep.subr.bf16.mxu1 %v1959_v42 }
  0x45   : > { %1713 = vmatmul.mubr.msk.bf16.gmra.mxu0 %vm431_vm0, %v1911_v38  ;;  %1721 = vmatmul.mubr.msk.bf16.gmra.mxu1 %vm431_vm0, %v1919_v43  ;;  %v1977_v38 = vld [vmem:[%s2615_s5 + $0x58] sm:$0xff]  }
  0x46   : > { %582 = vmatprep.mubr.bf16.mxu0 %v2057_v2  ;;  %662 = vmatprep.mubr.bf16.mxu1 %v2057_v2 }
  0x47   : > { %998 = vmatpush2.bf16.msra.mxu1 %v1957_v45  ;;  %1782 = vmatprep.subr.bf16.mxu0 %v1977_v38 }
  0x48   : > { %999 = vmatprep.subr.bf16.mxu1 %v1962_v47 }
  0x4b   : > { %1000 = vmatpush2.bf16.msra.mxu1 %v1960_v48 }
  0x4c   : > { %1001 = vmatprep.subr.bf16.mxu1 %v1965_v49  ;;  %v1979_v49 = vld [vmem:[%s2615_s5 + $0x50] sm:$0xff]  }
  0x4d   : > { %1714 = vmatmul.mubr.msk.bf16.gmra.mxu0 %vm431_vm0, %v1912_v44  ;;  %1722 = vmatmul.mubr.msk.bf16.gmra.mxu1 %vm431_vm0, %v1920_v46  ;;  %v1978_v46 = vld [vmem:[%s2615_s5 + $0x18] sm:$0xff]  }
  0x4e   : > { %1783 = vmatpush3.bf16.msra.mxu0 %v1978_v46 }
  0x4f   : > { %1002 = vmatpush2.bf16.msra.mxu1 %v1963_v50  ;;  %1784 = vmatprep.subr.bf16.mxu0 %v1979_v49 }
  0x50   : > { %1003 = vmatprep.subr.bf16.mxu1 %v1968_v51 }
  0x53   : > { %1004 = vmatpush2.bf16.msra.mxu1 %v1966_v52 }
  0xd5   : > { %v514_v58 = vpop.f32.mrf.mxu0  ;;  %v2298_v7 = vpop.f32.mrf.mxu1 }
  0xd6   : > { %v515_v1 = vadd.f32 %v514_v58, %v2283_v60 }
  0xd7   : > { %v516_v61 = vpop.f32.mrf.mxu0  ;;  %v2300_v12 = vpop.f32.mrf.mxu1 }
  0xd8   : > { %v517_v63 = vadd.f32 %v516_v61, %v2279_v59  ;;  %v673_v14 = vmax.f32 %v515_v1, 0.0  ;;  %v1981_v1 = vld [vmem:[%s2615_s5 + $0x48] sm:$0xff]  }
  0xd9   : > { %v518_v62 = vpop.f32.mrf.mxu0  ;;  %v2308_v18 = vpop.f32.mrf.mxu1 }
  0xda   : > { %v519_v0 = vadd.f32 %v518_v62, %v2283_v60  ;;  %v674_v10 = vmax.f32 %v517_v63, 0.0  ;;  %v1980_v62 = vld [vmem:[%s2615_s5 + $0x10] sm:$0xff]  }
  0xdb   : > { %v520_v2 = vpop.f32.mrf.mxu0  ;;  %v2312_v23 = vpop.f32.mrf.mxu1  ;;  %1785 = vmatpush3.bf16.msra.mxu0 %v1980_v62 }
  0xdc   : > { %v521_v6 = vadd.f32 %v520_v2, %v2279_v59  ;;  %v675_v8 = vmax.f32 %v519_v0, 0.0  ;;  %1786 = vmatprep.subr.bf16.mxu0 %v1981_v1 }
  0xdd   : > { %v524_v9 = vpop.f32.mrf.mxu0  ;;  %v2322_v29 = vpop.f32.mrf.mxu1 }
  0xde   : > { %v676_v11 = vmax.f32 %v521_v6, 0.0  ;;  %v737_v19 = vpack.c.bf16 %v675_v8, %v673_v14  ;;  %v525_v25 = vadd.f32 %v524_v9, %v2283_v60  ;;  %v1982_v9 = vld [vmem:[%s2615_s5 + $0x8] sm:$0xff]  }
  0xdf   : > { %v526_v15 = vpop.f32.mrf.mxu0  ;;  %v2324_v34 = vpop.f32.mrf.mxu1  ;;  %1787 = vmatpush3.bf16.msra.mxu0 %v1982_v9 }
  0xe0   : > { %v738_v17 = vpack.c.bf16 %v676_v11, %v674_v10  ;;  %v527_v21 = vadd.f32 %v526_v15, %v2279_v59  ;;  %v677_v36 = vmax.f32 %v525_v25, 0.0 }
  0xe1   : > { %v528_v20 = vpop.f32.mrf.mxu0  ;;  %v2332_v40 = vpop.f32.mrf.mxu1 }
  0xe2   : > { %v529_v22 = vadd.f32 %v528_v20, %v2283_v60  ;;  %1005 = vmatprep.mubr.bf16.mxu1 %v738_v17  ;;  %v678_v32 = vmax.f32 %v527_v21, 0.0 }
  0xe3   : > { %v530_v26 = vpop.f32.mrf.mxu0  ;;  %1006 = vmatmul.mubr.bf16.vlgmr.msra.gmra.mxu1 %v737_v19  ;;  %v2336_v45 = vpop.f32.mrf.mxu1 }
  0xe4   : > { %v531_v28 = vadd.f32 %v530_v26, %v2279_v59  ;;  %v679_v30 = vmax.f32 %v529_v22, 0.0 }
  0xe5   : > { %v534_v31 = vpop.f32.mrf.mxu0  ;;  %v2346_v51 = vpop.f32.mrf.mxu1 }
  0xe6   : > { %v680_v33 = vmax.f32 %v531_v28, 0.0  ;;  %v739_v41 = vpack.c.bf16 %v679_v30, %v677_v36  ;;  %v535_v47 = vadd.f32 %v534_v31, %v2283_v60 }
  0xe7   : > { %v536_v37 = vpop.f32.mrf.mxu0  ;;  %v2348_v61 = vpop.f32.mrf.mxu1 }
  0xe8   : > { %v740_v39 = vpack.c.bf16 %v680_v33, %v678_v32  ;;  %v537_v43 = vadd.f32 %v536_v37, %v2279_v59  ;;  %v681_v63 = vmax.f32 %v535_v47, 0.0 }
  0xe9   : > { %v538_v42 = vpop.f32.mrf.mxu0  ;;  %v2356_v5 = vpop.f32.mrf.mxu1 }
  0xea   : > { %v539_v44 = vadd.f32 %v538_v42, %v2283_v60  ;;  %1015 = vmatprep.mubr.bf16.mxu1 %v740_v39  ;;  %v682_v57 = vmax.f32 %v537_v43, 0.0 }
  0xeb   : > { %v540_v48 = vpop.f32.mrf.mxu0  ;;  %1016 = vmatmul.mubr.bf16.gmra.mxu1 %v739_v41  ;;  %v2365_v16 = vpop.f32.mrf.mxu1 }
  0xec   : > { %v541_v50 = vadd.f32 %v540_v48, %v2279_v59  ;;  %v683_v52 = vmax.f32 %v539_v44, 0.0 }
  0xed   : > { %v544_v53 = vpop.f32.mrf.mxu0  ;;  %v2367_v26 = vpop.f32.mrf.mxu1 }
  0xee   : > { %v684_v58 = vmax.f32 %v541_v50, 0.0  ;;  %v741_v3 = vpack.c.bf16 %v683_v52, %v681_v63  ;;  %v545_v10 = vadd.f32 %v544_v53, %v2283_v60 }
  0xef   : > { %v546_v0 = vpop.f32.mrf.mxu0  ;;  %v2373_v36 = vpop.f32.mrf.mxu1 }
  0xf0   : > { %v742_v2 = vpack.c.bf16 %v684_v58, %v682_v57  ;;  %v547_v6 = vadd.f32 %v546_v0, %v2279_v59  ;;  %v685_v20 = vmax.f32 %v545_v10, 0.0 }
  0xf1   : > { %v548_v4 = vpop.f32.mrf.mxu0  ;;  %v2375_v46 = vpop.f32.mrf.mxu1 }
  0xf2   : > { %v549_v8 = vadd.f32 %v548_v4, %v2283_v60  ;;  %1025 = vmatprep.mubr.bf16.mxu1 %v742_v2  ;;  %v686_v17 = vmax.f32 %v547_v6, 0.0 }
  0xf3   : > { %v550_v11 = vpop.f32.mrf.mxu0  ;;  %1026 = vmatmul.mubr.bf16.gmra.mxu1 %v741_v3  ;;  %v2381_v58 = vpop.f32.mrf.mxu1 }
  0xf4   : > { %v551_v13 = vadd.f32 %v550_v11, %v2279_v59  ;;  %v687_v14 = vmax.f32 %v549_v8, 0.0 }
  0xf5   : > { %v554_v15 = vpop.f32.mrf.mxu0  ;;  %v2383_v6 = vpop.f32.mrf.mxu1 }
  0xf6   : > { %v688_v19 = vmax.f32 %v551_v13, 0.0  ;;  %v743_v24 = vpack.c.bf16 %v687_v14, %v685_v20  ;;  %v555_v30 = vadd.f32 %v554_v15, %v2283_v60 }
  0xf7   : > { %v556_v21 = vpop.f32.mrf.mxu0 }
  0xf8   : > { %v744_v22 = vpack.c.bf16 %v688_v19, %v686_v17  ;;  %v557_v27 = vadd.f32 %v556_v21, %v2279_v59  ;;  %v689_v39 = vmax.f32 %v555_v30, 0.0  ;;  %v2389_v17 = vpop.f32.mrf.mxu1 }
  0xf9   : > { %v558_v25 = vpop.f32.mrf.mxu0 }
  0xfa   : > { %v559_v28 = vadd.f32 %v558_v25, %v2283_v60  ;;  %1035 = vmatprep.mubr.bf16.mxu1 %v744_v22  ;;  %v690_v37 = vmax.f32 %v557_v27, 0.0  ;;  %v597_v25 = vadd.f32 %v2300_v12, %v2279_v59  ;;  %v601_v27 = vadd.f32 %v2312_v23, %v2279_v59 }
  0xfb   : > { %v560_v31 = vpop.f32.mrf.mxu0  ;;  %1036 = vmatmul.mubr.bf16.gmra.mxu1 %v743_v24 }
  0xfc   : > { %v561_v32 = vadd.f32 %v560_v31, %v2279_v59  ;;  %v691_v33 = vmax.f32 %v559_v28, 0.0  ;;  %v2395_v31 = vpop.f32.mrf.mxu1  ;;  %v708_v12 = vmax.f32 %v601_v27, 0.0 }
  0xfd   : > { %v564_v35 = vpop.f32.mrf.mxu0 }
  0xfe   : > { %v692_v38 = vmax.f32 %v561_v32, 0.0  ;;  %v745_v43 = vpack.c.bf16 %v691_v33, %v689_v39  ;;  %v565_v49 = vadd.f32 %v564_v35, %v2283_v60 }
  0xff   : > { %v566_v41 = vpop.f32.mrf.mxu0 }
 0x100   : > { %v746_v42 = vpack.c.bf16 %v692_v38, %v690_v37  ;;  %v567_v47 = vadd.f32 %v566_v41, %v2279_v59  ;;  %v693_v0 = vmax.f32 %v565_v49, 0.0  ;;  %v706_v38 = vmax.f32 %v597_v25, 0.0 }
 0x101   : > { %v568_v44 = vpop.f32.mrf.mxu0  ;;  %v607_v49 = vadd.f32 %v2324_v34, %v2279_v59 }
 0x102   : > { %v569_v48 = vadd.f32 %v568_v44, %v2283_v60  ;;  %1045 = vmatprep.mubr.bf16.mxu1 %v746_v42  ;;  %v694_v62 = vmax.f32 %v567_v47, 0.0  ;;  %v640_v42 = vpop.f32.mrf.mxu1 }
 0x103   : > { %v570_v50 = vpop.f32.mrf.mxu0  ;;  %1046 = vmatmul.mubr.bf16.gmra.mxu1 %v745_v43 }
 0x104   : > { %v571_v52 = vadd.f32 %v570_v50, %v2279_v59  ;;  %v695_v53 = vmax.f32 %v569_v48, 0.0  ;;  %v754_v48 = vpack.c.bf16 %v708_v12, %v706_v38  ;;  %v611_v50 = vadd.f32 %v2336_v45, %v2279_v59 }
 0x105   : > { %v574_v57 = vpop.f32.mrf.mxu0  ;;  %v617_v45 = vadd.f32 %v2348_v61, %v2279_v59  ;;  %v627_v61 = vadd.f32 %v2373_v36, %v2279_v59  ;;  %v1984_v36 = vld [vmem:[%s2615_s5] sm:$0xff]  }
 0x106   : > { %v696_v63 = vmax.f32 %v571_v52, 0.0  ;;  %v747_v3 = vpack.c.bf16 %v695_v53, %v693_v0  ;;  %v575_v10 = vadd.f32 %v574_v57, %v2283_v60  ;;  %v595_v52 = vadd.f32 %v2298_v7, %v2283_v60 }
 0x107   : > { %v576_v1 = vpop.f32.mrf.mxu0  ;;  %v599_v57 = vadd.f32 %v2308_v18, %v2283_v60  ;;  %v712_v0 = vmax.f32 %v611_v50, 0.0  ;;  %v621_v7 = vadd.f32 %v2365_v16, %v2279_v59  ;;  %v605_v18 = vadd.f32 %v2322_v29, %v2283_v60 }
 0x108   : > { %v748_v2 = vpack.c.bf16 %v696_v63, %v694_v62  ;;  %v577_v8 = vadd.f32 %v576_v1, %v2279_v59  ;;  %v697_v21 = vmax.f32 %v575_v10, 0.0  ;;  %v2409_v62 = vpop.f32.mrf.mxu1  ;;  %v710_v63 = vmax.f32 %v607_v49, 0.0 }
 0x109   : > { %v578_v4 = vpop.f32.mrf.mxu0  ;;  %v705_v1 = vmax.f32 %v595_v52, 0.0  ;;  %v714_v10 = vmax.f32 %v617_v45, 0.0  ;;  %v631_v16 = vadd.f32 %v2381_v58, %v2279_v59  ;;  %v615_v29 = vadd.f32 %v2346_v51, %v2283_v60 }
 0x10a   : > { %v579_v9 = vadd.f32 %v578_v4, %v2283_v60  ;;  %1055 = vmatprep.mubr.bf16.mxu1 %v748_v2  ;;  %v698_v19 = vmax.f32 %v577_v8, 0.0  ;;  %v707_v2 = vmax.f32 %v599_v57, 0.0  ;;  %v646_v34 = vpop.f32.mrf.mxu1  ;;  %v609_v8 = vadd.f32 %v2332_v40, %v2283_v60 }
 0x10b   : > { %v580_v11 = vpop.f32.mrf.mxu0  ;;  %1056 = vmatmul.mubr.bf16.gmra.mxu1 %v747_v3  ;;  %v756_v3 = vpack.c.bf16 %v712_v0, %v710_v63  ;;  %v619_v40 = vadd.f32 %v2356_v5, %v2283_v60  ;;  %v720_v25 = vmax.f32 %v631_v16, 0.0  ;;  %v713_v58 = vmax.f32 %v615_v29, 0.0 }
 0x10c   : > { %v581_v13 = vadd.f32 %v580_v11, %v2279_v59  ;;  %v699_v14 = vmax.f32 %v579_v9, 0.0  ;;  %v753_v4 = vpack.c.bf16 %v707_v2, %v705_v1  ;;  %v648_v9 = vpop.f32.mrf.mxu1  ;;  %v716_v11 = vmax.f32 %v621_v7, 0.0 }
 0x10d   : > { %v584_v15 = vpop.f32.mrf.mxu0  ;;  %v715_v27 = vmax.f32 %v619_v40, 0.0  ;;  %v637_v5 = vadd.f32 %v2389_v17, %v2279_v59  ;;  %v647_v17 = vadd.f32 %v646_v34, %v2279_v59  ;;  %v649_v2 = vadd.f32 %v648_v9, %v2283_v60 }
 0x10e   : > { %v700_v20 = vmax.f32 %v581_v13, 0.0  ;;  %v749_v28 = vpack.c.bf16 %v699_v14, %v697_v21  ;;  %v585_v35 = vadd.f32 %v584_v15, %v2283_v60  ;;  %v709_v13 = vmax.f32 %v605_v18, 0.0  ;;  %v650_v15 = vpop.f32.mrf.mxu1 }
 0x10f   : > { %v586_v22 = vpop.f32.mrf.mxu0  ;;  %v711_v14 = vmax.f32 %v609_v8, 0.0  ;;  %v722_v38 = vmax.f32 %v637_v5, 0.0  ;;  %v727_v7 = vmax.f32 %v649_v2, 0.0 }
 0x110   : > { %v750_v24 = vpack.c.bf16 %v700_v20, %v698_v19  ;;  %v587_v32 = vadd.f32 %v586_v22, %v2279_v59  ;;  %v701_v44 = vmax.f32 %v585_v35, 0.0  ;;  %v758_v19 = vpack.c.bf16 %v716_v11, %v714_v10  ;;  %v654_v21 = vpop.f32.mrf.mxu1  ;;  %v1983_v22 = vld [vmem:[%s2615_s5 + $0x40] sm:$0xff]  }
 0x111   : > { %v588_v30 = vpop.f32.mrf.mxu0  ;;  %v755_v20 = vpack.c.bf16 %v711_v14, %v709_v13  ;;  %1788 = vmatprep.subr.bf16.mxu0 %v1983_v22  ;;  %v629_v35 = vadd.f32 %v2375_v46, %v2283_v60  ;;  %v639_v46 = vadd.f32 %v2395_v31, %v2283_v60  ;;  %v655_v13 = vadd.f32 %v654_v21, %v2283_v60  ;;  %v801_v21 = vld [vmem:[%s2614_s4] sm:$0x3] }
 0x112   : > { %v589_v33 = vadd.f32 %v588_v30, %v2283_v60  ;;  %1065 = vmatprep.mubr.bf16.mxu1 %v750_v24  ;;  %v702_v23 = vmax.f32 %v587_v32, 0.0  ;;  %v718_v24 = vmax.f32 %v627_v61, 0.0  ;;  %1789 = vmatpush3.bf16.msra.mxu0 %v1984_v36  ;;  %v641_v30 = vadd.f32 %v640_v42, %v2279_v59 }
 0x113   : > { %v590_v37 = vpop.f32.mrf.mxu0  ;;  %1066 = vmatmul.mubr.bf16.gmra.mxu1 %v749_v28  ;;  %v656_v28 = vpop.f32.mrf.mxu1  ;;  %v757_v32 = vpack.c.bf16 %v715_v27, %v713_v58  ;;  %v651_v42 = vadd.f32 %v650_v15, %v2279_v59  ;;  %v723_v52 = vmax.f32 %v639_v46, 0.0  ;;  %v729_v15 = vmax.f32 %v655_v13, 0.0 }
 0x114   : > { %v591_v39 = vadd.f32 %v590_v37, %v2279_v59  ;;  %v703_v41 = vmax.f32 %v589_v33, 0.0  ;;  %v760_v51 = vpack.c.bf16 %v720_v25, %v718_v24  ;;  %v625_v33 = vadd.f32 %v2367_v26, %v2283_v60 }
 0x115   : > { %v658_v37 = vpop.f32.mrf.mxu1  ;;  %v635_v26 = vadd.f32 %v2383_v6, %v2283_v60  ;;  %v728_v49 = vmax.f32 %v651_v42, 0.0  ;;  %v657_v63 = vadd.f32 %v656_v28, %v2279_v59  ;;  %v645_v6 = vadd.f32 %v2409_v62, %v2283_v60 }
 0x116   : > { %v704_v43 = vmax.f32 %v591_v39, 0.0  ;;  %v751_v53 = vpack.c.bf16 %v703_v41, %v701_v44  ;;  %v724_v39 = vmax.f32 %v641_v30, 0.0  ;;  %v717_v12 = vmax.f32 %v625_v33, 0.0 }
 0x117   : > { %v719_v41 = vmax.f32 %v629_v35, 0.0  ;;  %v721_v50 = vmax.f32 %v635_v26, 0.0  ;;  %v730_v34 = vmax.f32 %v657_v63, 0.0  ;;  %v725_v45 = vmax.f32 %v645_v6, 0.0 }
 0x118   : > { %v752_v47 = vpack.c.bf16 %v704_v43, %v702_v23  ;;  %v660_v23 = vpop.f32.mrf.mxu1  ;;  %v762_v43 = vpack.c.bf16 %v724_v39, %v722_v38  ;;  %v659_v62 = vadd.f32 %v658_v37, %v2283_v60  ;;  %v2462_v25 = vrot.slane %v801_v21, %v327_v55 }
 0x119   : > { %v759_v44 = vpack.c.bf16 %v719_v41, %v717_v12  ;;  %v661_v0 = vadd.f32 %v660_v23, %v2279_v59  ;;  %v761_v1 = vpack.c.bf16 %v723_v52, %v721_v50  ;;  %v763_v11 = vpack.c.bf16 %v727_v7, %v725_v45 }
 0x11a   : > { %1075 = vmatprep.mubr.bf16.mxu1 %v752_v47  ;;  %v664_v47 = vpop.f32.mrf.mxu1  ;;  %v2466_v36 = vrot.slane %v801_v21, %v323_v56 }
 0x11b   : > { %1076 = vmatmul.mubr.bf16.gmra.mxu1 %v751_v53 }
 0x11c   : > { %1085 = vmatprep.mubr.bf16.mxu1 %v754_v48  ;;  %v726_v48 = vmax.f32 %v647_v17, 0.0  ;;  %v666_v53 = vpop.f32.mrf.mxu1 }
 0x11d   : > { %v667_v8 = vadd.f32 %v666_v53, %v2279_v59 }
 0x11e   : > { %v764_v57 = vpack.c.bf16 %v728_v49, %v726_v48  ;;  %v668_v31 = vpop.f32.mrf.mxu1 }
 0x11f   : > { %v734_v9 = vmax.f32 %v667_v8, 0.0  ;;  %v669_v29 = vadd.f32 %v668_v31, %v2283_v60 }
 0x121   : > { %v735_v40 = vmax.f32 %v669_v29, 0.0 }
 0x123   : > { %1086 = vmatmul.mubr.bf16.gmra.mxu1 %v753_v4  ;;  %v670_v4 = vpop.f32.mrf.mxu1 }
 0x124   : > { %1095 = vmatprep.mubr.bf16.mxu1 %v756_v3  ;;  %v732_v3 = vmax.f32 %v661_v0, 0.0  ;;  %v671_v10 = vadd.f32 %v670_v4, %v2279_v59 }
 0x126   : > { %v766_v18 = vpack.c.bf16 %v732_v3, %v730_v34  ;;  %v736_v14 = vmax.f32 %v671_v10, 0.0 }
 0x128   : > { %v768_v61 = vpack.c.bf16 %v736_v14, %v734_v9 }
 0x12b   : > { %1096 = vmatmul.mubr.bf16.gmra.mxu1 %v755_v20  ;;  %v665_v20 = vadd.f32 %v664_v47, %v2283_v60 }
 0x12c   : > { %1105 = vmatprep.mubr.bf16.mxu1 %v758_v19  ;;  %v731_v19 = vmax.f32 %v659_v62, 0.0 }
 0x12d   : > { %v733_v59 = vmax.f32 %v665_v20, 0.0 }
 0x12e   : > { %v765_v16 = vpack.c.bf16 %v731_v19, %v729_v15 }
 0x12f   : > { %v767_v22 = vpack.c.bf16 %v735_v40, %v733_v59 }
 0x133   : > { %1106 = vmatmul.mubr.bf16.gmra.mxu1 %v757_v32 }
 0x134   : > { %1115 = vmatprep.mubr.bf16.mxu1 %v760_v51 }
 0x13b   : > { %1116 = vmatmul.mubr.bf16.gmra.mxu1 %v759_v44 }
 0x13c   : > { %1125 = vmatprep.mubr.bf16.mxu1 %v762_v43 }
 0x143   : > { %1126 = vmatmul.mubr.bf16.gmra.mxu1 %v761_v1 }
 0x144   : > { %1135 = vmatprep.mubr.bf16.mxu1 %v764_v57 }
 0x14b   : > { %1136 = vmatmul.mubr.bf16.gmra.mxu1 %v763_v11 }
 0x14c   : > { %1145 = vmatprep.mubr.bf16.mxu1 %v766_v18 }
 0x153   : > { %1146 = vmatmul.mubr.bf16.gmra.mxu1 %v765_v16 }
 0x154   : > { %1155 = vmatprep.mubr.bf16.mxu1 %v768_v61 }
 0x15b   : > { %1156 = vmatmul.mubr.bf16.gmra.mxu1 %v767_v22 }
 0x1a3   : > { %v1007_v24 = vpop.f32.mrf.mxu1 }
 0x1a4   : > { %v1008_v51 = vadd.f32 %v1007_v24, %v2466_v36 }
 0x1a5   : > { %v1009_v60 = vpop.f32.mrf.mxu1 }
 0x1a6   : > { %v1010_v27 = vadd.f32 %v1009_v60, %v2462_v25  ;;  %v1166_v37 = vmax.f32 %v1008_v51, 0.0 }
 0x1a7   : > { %v1011_v58 = vpop.f32.mrf.mxu1 }
 0x1a8   : > { %v1012_v28 = vadd.f32 %v1011_v58, %v2466_v36  ;;  %v1167_v35 = vmax.f32 %v1010_v27, 0.0 }
 0x1a9   : > { %v1013_v5 = vpop.f32.mrf.mxu1 }
 0x1aa   : > { %v1014_v30 = vadd.f32 %v1013_v5, %v2462_v25  ;;  %v1168_v32 = vmax.f32 %v1012_v28, 0.0 }
 0x1ab   : > { %v1017_v33 = vpop.f32.mrf.mxu1 }
 0x1ac   : > { %v1169_v55 = vmax.f32 %v1014_v30, 0.0  ;;  %v1230_v56 = vpack.c.bf16 %v1168_v32, %v1166_v37  ;;  %v1018_v23 = vadd.f32 %v1017_v33, %v2466_v36 }
 0x1ad   : > { %v1019_v38 = vpop.f32.mrf.mxu1 }
 0x1ae   : > { %v1231_v54 = vpack.c.bf16 %v1169_v55, %v1167_v35  ;;  %v1020_v12 = vadd.f32 %v1019_v38, %v2462_v25  ;;  %v1170_v47 = vmax.f32 %v1018_v23, 0.0 }
 0x1af   : > { %v1021_v39 = vpop.f32.mrf.mxu1 }
 0x1b0   : > { %v1022_v41 = vadd.f32 %v1021_v39, %v2466_v36  ;;  %1429 = vmatprep.mubr.bf16.mxu0 %v1231_v54  ;;  %v1171_v26 = vmax.f32 %v1020_v12, 0.0 }
 0x1b1   : > { %v1023_v43 = vpop.f32.mrf.mxu1  ;;  %1430 = vmatmul.mubr.bf16.vlgmr.msra.gmra.mxu0 %v1230_v56 }
 0x1b2   : > { %v1024_v17 = vadd.f32 %v1023_v43, %v2462_v25  ;;  %v1172_v42 = vmax.f32 %v1022_v41, 0.0 }
 0x1b3   : > { %v1027_v44 = vpop.f32.mrf.mxu1 }
 0x1b4   : > { %v1173_v46 = vmax.f32 %v1024_v17, 0.0  ;;  %v1232_v50 = vpack.c.bf16 %v1172_v42, %v1170_v47  ;;  %v1028_v63 = vadd.f32 %v1027_v44, %v2466_v36 }
 0x1b5   : > { %v1029_v48 = vpop.f32.mrf.mxu1 }
 0x1b6   : > { %v1233_v49 = vpack.c.bf16 %v1173_v46, %v1171_v26  ;;  %v1030_v53 = vadd.f32 %v1029_v48, %v2462_v25  ;;  %v1174_v3 = vmax.f32 %v1028_v63, 0.0 }
 0x1b7   : > { %v1031_v52 = vpop.f32.mrf.mxu1 }
 0x1b8   : > { %v1032_v57 = vadd.f32 %v1031_v52, %v2466_v36  ;;  %1437 = vmatprep.mubr.bf16.mxu0 %v1233_v49  ;;  %v1175_v31 = vmax.f32 %v1030_v53, 0.0 }
 0x1b9   : > { %v1033_v0 = vpop.f32.mrf.mxu1  ;;  %1438 = vmatmul.mubr.bf16.gmra.mxu0 %v1232_v50 }
 0x1ba   : > { %v1034_v1 = vadd.f32 %v1033_v0, %v2462_v25  ;;  %v1176_v6 = vmax.f32 %v1032_v57, 0.0 }
 0x1bb   : > { %v1037_v2 = vpop.f32.mrf.mxu1 }
 0x1bc   : > { %v1177_v34 = vmax.f32 %v1034_v1, 0.0  ;;  %v1234_v4 = vpack.c.bf16 %v1176_v6, %v1174_v3  ;;  %v1038_v11 = vadd.f32 %v1037_v2, %v2466_v36 }
 0x1bd   : > { %v1039_v45 = vpop.f32.mrf.mxu1 }
 0x1be   : > { %v1235_v7 = vpack.c.bf16 %v1177_v34, %v1175_v31  ;;  %v1040_v8 = vadd.f32 %v1039_v45, %v2462_v25  ;;  %v1178_v61 = vmax.f32 %v1038_v11, 0.0 }
 0x1bf   : > { %v1041_v18 = vpop.f32.mrf.mxu1 }
 0x1c0   : > { %v1042_v10 = vadd.f32 %v1041_v18, %v2466_v36  ;;  %1445 = vmatprep.mubr.bf16.mxu0 %v1235_v7  ;;  %v1179_v15 = vmax.f32 %v1040_v8, 0.0 }
 0x1c1   : > { %v1043_v13 = vpop.f32.mrf.mxu1  ;;  %1446 = vmatmul.mubr.bf16.gmra.mxu0 %v1234_v4 }
 0x1c2   : > { %v1044_v62 = vadd.f32 %v1043_v13, %v2462_v25  ;;  %v1180_v9 = vmax.f32 %v1042_v10, 0.0 }
 0x1c3   : > { %v1047_v14 = vpop.f32.mrf.mxu1 }
 0x1c4   : > { %v1181_v19 = vmax.f32 %v1044_v62, 0.0  ;;  %v1236_v29 = vpack.c.bf16 %v1180_v9, %v1178_v61  ;;  %v1048_v21 = vadd.f32 %v1047_v14, %v2466_v36 }
 0x1c5   : > { %v1049_v16 = vpop.f32.mrf.mxu1 }
 0x1c6   : > { %v1237_v20 = vpack.c.bf16 %v1181_v19, %v1179_v15  ;;  %v1050_v40 = vadd.f32 %v1049_v16, %v2462_v25  ;;  %v1182_v5 = vmax.f32 %v1048_v21, 0.0 }
 0x1c7   : > { %v1051_v59 = vpop.f32.mrf.mxu1 }
 0x1c8   : > { %v1052_v22 = vadd.f32 %v1051_v59, %v2466_v36  ;;  %1453 = vmatprep.mubr.bf16.mxu0 %v1237_v20  ;;  %v1183_v28 = vmax.f32 %v1050_v40, 0.0 }
 0x1c9   : > { %v1053_v24 = vpop.f32.mrf.mxu1  ;;  %1454 = vmatmul.mubr.bf16.gmra.mxu0 %v1236_v29 }
 0x1ca   : > { %v1054_v60 = vadd.f32 %v1053_v24, %v2462_v25  ;;  %v1184_v58 = vmax.f32 %v1052_v22, 0.0 }
 0x1cb   : > { %v1057_v27 = vpop.f32.mrf.mxu1 }
 0x1cc   : > { %v1185_v51 = vmax.f32 %v1054_v60, 0.0  ;;  %v1238_v33 = vpack.c.bf16 %v1184_v58, %v1182_v5  ;;  %v1058_v38 = vadd.f32 %v1057_v27, %v2466_v36 }
 0x1cd   : > { %v1059_v30 = vpop.f32.mrf.mxu1 }
 0x1ce   : > { %v1239_v32 = vpack.c.bf16 %v1185_v51, %v1183_v28  ;;  %v1060_v55 = vadd.f32 %v1059_v30, %v2462_v25  ;;  %v1186_v43 = vmax.f32 %v1058_v38, 0.0 }
 0x1cf   : > { %v1061_v35 = vpop.f32.mrf.mxu1 }
 0x1d0   : > { %v1062_v37 = vadd.f32 %v1061_v35, %v2466_v36  ;;  %1461 = vmatprep.mubr.bf16.mxu0 %v1239_v32  ;;  %v1187_v41 = vmax.f32 %v1060_v55, 0.0 }
 0x1d1   : > { %v1063_v54 = vpop.f32.mrf.mxu1  ;;  %1462 = vmatmul.mubr.bf16.gmra.mxu0 %v1238_v33 }
 0x1d2   : > { %v1064_v56 = vadd.f32 %v1063_v54, %v2462_v25  ;;  %v1188_v39 = vmax.f32 %v1062_v37, 0.0 }
 0x1d3   : > { %v1067_v12 = vpop.f32.mrf.mxu1 }
 0x1d4   : > { %v1189_v23 = vmax.f32 %v1064_v56, 0.0  ;;  %v1240_v44 = vpack.c.bf16 %v1188_v39, %v1186_v43  ;;  %v1068_v48 = vadd.f32 %v1067_v12, %v2466_v36 }
 0x1d5   : > { %v1069_v17 = vpop.f32.mrf.mxu1 }
 0x1d6   : > { %v1241_v42 = vpack.c.bf16 %v1189_v23, %v1187_v41  ;;  %v1070_v46 = vadd.f32 %v1069_v17, %v2462_v25  ;;  %v1190_v0 = vmax.f32 %v1068_v48, 0.0 }
 0x1d7   : > { %v1071_v26 = vpop.f32.mrf.mxu1 }
 0x1d8   : > { %v1072_v47 = vadd.f32 %v1071_v26, %v2466_v36  ;;  %1469 = vmatprep.mubr.bf16.mxu0 %v1241_v42  ;;  %v1191_v57 = vmax.f32 %v1070_v46, 0.0 }
 0x1d9   : > { %v1073_v49 = vpop.f32.mrf.mxu1  ;;  %1470 = vmatmul.mubr.bf16.gmra.mxu0 %v1240_v44 }
 0x1da   : > { %v1074_v50 = vadd.f32 %v1073_v49, %v2462_v25  ;;  %v1192_v52 = vmax.f32 %v1072_v47, 0.0 }
 0x1db   : > { %v1077_v53 = vpop.f32.mrf.mxu1 }
 0x1dc   : > { %v1193_v63 = vmax.f32 %v1074_v50, 0.0  ;;  %v1242_v2 = vpack.c.bf16 %v1192_v52, %v1190_v0  ;;  %v1078_v45 = vadd.f32 %v1077_v53, %v2466_v36 }
 0x1dd   : > { %v1079_v1 = vpop.f32.mrf.mxu1 }
 0x1de   : > { %v1243_v6 = vpack.c.bf16 %v1193_v63, %v1191_v57  ;;  %v1080_v34 = vadd.f32 %v1079_v1, %v2462_v25  ;;  %v1194_v13 = vmax.f32 %v1078_v45, 0.0 }
 0x1df   : > { %v1081_v31 = vpop.f32.mrf.mxu1 }
 0x1e0   : > { %v1082_v3 = vadd.f32 %v1081_v31, %v2466_v36  ;;  %1477 = vmatprep.mubr.bf16.mxu0 %v1243_v6  ;;  %v1195_v10 = vmax.f32 %v1080_v34, 0.0 }
 0x1e1   : > { %v1083_v7 = vpop.f32.mrf.mxu1  ;;  %1478 = vmatmul.mubr.bf16.gmra.mxu0 %v1242_v2 }
 0x1e2   : > { %v1084_v4 = vadd.f32 %v1083_v7, %v2462_v25  ;;  %v1196_v18 = vmax.f32 %v1082_v3, 0.0 }
 0x1e3   : > { %v1087_v8 = vpop.f32.mrf.mxu1 }
 0x1e4   : > { %v1197_v11 = vmax.f32 %v1084_v4, 0.0  ;;  %v1244_v14 = vpack.c.bf16 %v1196_v18, %v1194_v13  ;;  %v1088_v16 = vadd.f32 %v1087_v8, %v2466_v36 }
 0x1e5   : > { %v1089_v62 = vpop.f32.mrf.mxu1 }
 0x1e6   : > { %v1245_v9 = vpack.c.bf16 %v1197_v11, %v1195_v10  ;;  %v1090_v19 = vadd.f32 %v1089_v62, %v2462_v25  ;;  %v1198_v24 = vmax.f32 %v1088_v16, 0.0 }
 0x1e7   : > { %v1091_v15 = vpop.f32.mrf.mxu1 }
 0x1e8   : > { %v1092_v61 = vadd.f32 %v1091_v15, %v2466_v36  ;;  %1485 = vmatprep.mubr.bf16.mxu0 %v1245_v9  ;;  %v1199_v22 = vmax.f32 %v1090_v19, 0.0 }
 0x1e9   : > { %v1093_v20 = vpop.f32.mrf.mxu1  ;;  %1486 = vmatmul.mubr.bf16.gmra.mxu0 %v1244_v14 }
 0x1ea   : > { %v1094_v29 = vadd.f32 %v1093_v20, %v2462_v25  ;;  %v1200_v59 = vmax.f32 %v1092_v61, 0.0 }
 0x1eb   : > { %v1097_v40 = vpop.f32.mrf.mxu1 }
 0x1ec   : > { %v1201_v21 = vmax.f32 %v1094_v29, 0.0  ;;  %v1246_v27 = vpack.c.bf16 %v1200_v59, %v1198_v24  ;;  %v1098_v30 = vadd.f32 %v1097_v40, %v2466_v36 }
 0x1ed   : > { %v1099_v60 = vpop.f32.mrf.mxu1 }
 0x1ee   : > { %v1247_v58 = vpack.c.bf16 %v1201_v21, %v1199_v22  ;;  %v1100_v51 = vadd.f32 %v1099_v60, %v2462_v25  ;;  %v1202_v54 = vmax.f32 %v1098_v30, 0.0 }
 0x1ef   : > { %v1101_v28 = vpop.f32.mrf.mxu1 }
 0x1f0   : > { %v1102_v5 = vadd.f32 %v1101_v28, %v2466_v36  ;;  %1493 = vmatprep.mubr.bf16.mxu0 %v1247_v58  ;;  %v1203_v37 = vmax.f32 %v1100_v51, 0.0 }
 0x1f1   : > { %v1103_v32 = vpop.f32.mrf.mxu1  ;;  %1494 = vmatmul.mubr.bf16.gmra.mxu0 %v1246_v27 }
 0x1f2   : > { %v1104_v33 = vadd.f32 %v1103_v32, %v2462_v25  ;;  %v1204_v35 = vmax.f32 %v1102_v5, 0.0 }
 0x1f3   : > { %v1107_v55 = vpop.f32.mrf.mxu1 }
 0x1f4   : > { %v1205_v38 = vmax.f32 %v1104_v33, 0.0  ;;  %v1248_v12 = vpack.c.bf16 %v1204_v35, %v1202_v54  ;;  %v1108_v17 = vadd.f32 %v1107_v55, %v2466_v36 }
 0x1f5   : > { %v1109_v56 = vpop.f32.mrf.mxu1 }
 0x1f6   : > { %v1249_v39 = vpack.c.bf16 %v1205_v38, %v1203_v37  ;;  %v1110_v23 = vadd.f32 %v1109_v56, %v2462_v25  ;;  %v1206_v49 = vmax.f32 %v1108_v17, 0.0 }
 0x1f7   : > { %v1111_v41 = vpop.f32.mrf.mxu1 }
 0x1f8   : > { %v1112_v43 = vadd.f32 %v1111_v41, %v2466_v36  ;;  %1501 = vmatprep.mubr.bf16.mxu0 %v1249_v39  ;;  %v1207_v47 = vmax.f32 %v1110_v23, 0.0 }
 0x1f9   : > { %v1113_v42 = vpop.f32.mrf.mxu1  ;;  %1502 = vmatmul.mubr.bf16.gmra.mxu0 %v1248_v12 }
 0x1fa   : > { %v1114_v44 = vadd.f32 %v1113_v42, %v2462_v25  ;;  %v1208_v26 = vmax.f32 %v1112_v43, 0.0 }
 0x1fb   : > { %v1117_v46 = vpop.f32.mrf.mxu1 }
 0x1fc   : > { %v1209_v48 = vmax.f32 %v1114_v44, 0.0  ;;  %v1250_v53 = vpack.c.bf16 %v1208_v26, %v1206_v49  ;;  %v1118_v1 = vadd.f32 %v1117_v46, %v2466_v36 }
 0x1fd   : > { %v1119_v50 = vpop.f32.mrf.mxu1 }
 0x1fe   : > { %v1251_v52 = vpack.c.bf16 %v1209_v48, %v1207_v47  ;;  %v1120_v63 = vadd.f32 %v1119_v50, %v2462_v25  ;;  %v1210_v7 = vmax.f32 %v1118_v1, 0.0 }
 0x1ff   : > { %v1121_v57 = vpop.f32.mrf.mxu1 }
 0x200   : > { %v1122_v0 = vadd.f32 %v1121_v57, %v2466_v36  ;;  %1509 = vmatprep.mubr.bf16.mxu0 %v1251_v52  ;;  %v1211_v3 = vmax.f32 %v1120_v63, 0.0 }
 0x201   : > { %v1123_v6 = vpop.f32.mrf.mxu1  ;;  %1510 = vmatmul.mubr.bf16.gmra.mxu0 %v1250_v53 }
 0x202   : > { %v1124_v2 = vadd.f32 %v1123_v6, %v2462_v25  ;;  %v1212_v31 = vmax.f32 %v1122_v0, 0.0 }
 0x203   : > { %v1127_v34 = vpop.f32.mrf.mxu1 }
 0x204   : > { %v1213_v45 = vmax.f32 %v1124_v2, 0.0  ;;  %v1252_v8 = vpack.c.bf16 %v1212_v31, %v1210_v7  ;;  %v1128_v62 = vadd.f32 %v1127_v34, %v2466_v36  ;;  %v2535_v34 = vld [vmem:[%s2616_s6] ss:$0 sm:$0xff] }
 0x205   : > { %v1129_v4 = vpop.f32.mrf.mxu1 }
 0x206   : > { %v1253_v18 = vpack.c.bf16 %v1213_v45, %v1211_v3  ;;  %v1130_v11 = vadd.f32 %v1129_v4, %v2462_v25  ;;  %v1214_v20 = vmax.f32 %v1128_v62, 0.0 }
 0x207   : > { %v1131_v10 = vpop.f32.mrf.mxu1 }
 0x208   : > { %v1132_v13 = vadd.f32 %v1131_v10, %v2466_v36  ;;  %1517 = vmatprep.mubr.bf16.mxu0 %v1253_v18  ;;  %v1215_v61 = vmax.f32 %v1130_v11, 0.0 }
 0x209   : > { %v1133_v9 = vpop.f32.mrf.mxu1  ;;  %1518 = vmatmul.mubr.bf16.gmra.mxu0 %v1252_v8 }
 0x20a   : > { %v1134_v14 = vadd.f32 %v1133_v9, %v2462_v25  ;;  %v1216_v15 = vmax.f32 %v1132_v13, 0.0 }
 0x20b   : > { %v1137_v19 = vpop.f32.mrf.mxu1 }
 0x20c   : > { %v1217_v16 = vmax.f32 %v1134_v14, 0.0  ;;  %v1254_v40 = vpack.c.bf16 %v1216_v15, %v1214_v20  ;;  %v1138_v60 = vadd.f32 %v1137_v19, %v2466_v36 }
 0x20d   : > { %v1139_v29 = vpop.f32.mrf.mxu1 }
 0x20e   : > { %v1255_v59 = vpack.c.bf16 %v1217_v16, %v1215_v61  ;;  %v1140_v21 = vadd.f32 %v1139_v29, %v2462_v25  ;;  %v1218_v32 = vmax.f32 %v1138_v60, 0.0 }
 0x20f   : > { %v1141_v22 = vpop.f32.mrf.mxu1 }
 0x210   : > { %v1142_v24 = vadd.f32 %v1141_v22, %v2466_v36  ;;  %1525 = vmatprep.mubr.bf16.mxu0 %v1255_v59  ;;  %v1219_v5 = vmax.f32 %v1140_v21, 0.0 }
 0x211   : > { %v1143_v58 = vpop.f32.mrf.mxu1  ;;  %1526 = vmatmul.mubr.bf16.gmra.mxu0 %v1254_v40 }
 0x212   : > { %v1144_v27 = vadd.f32 %v1143_v58, %v2462_v25  ;;  %v1220_v28 = vmax.f32 %v1142_v24, 0.0 }
 0x213   : > { %v1147_v51 = vpop.f32.mrf.mxu1 }
 0x214   : > { %v1221_v30 = vmax.f32 %v1144_v27, 0.0  ;;  %v1256_v55 = vpack.c.bf16 %v1220_v28, %v1218_v32  ;;  %v1148_v56 = vadd.f32 %v1147_v51, %v2466_v36 }
 0x215   : > { %v1149_v33 = vpop.f32.mrf.mxu1 }
 0x216   : > { %v1257_v35 = vpack.c.bf16 %v1221_v30, %v1219_v5  ;;  %v1150_v38 = vadd.f32 %v1149_v33, %v2462_v25  ;;  %v1222_v42 = vmax.f32 %v1148_v56, 0.0 }
 0x217   : > { %v1151_v37 = vpop.f32.mrf.mxu1 }
 0x218   : > { %v1152_v54 = vadd.f32 %v1151_v37, %v2466_v36  ;;  %1533 = vmatprep.mubr.bf16.mxu0 %v1257_v35  ;;  %v1223_v43 = vmax.f32 %v1150_v38, 0.0 }
 0x219   : > { %v1153_v39 = vpop.f32.mrf.mxu1  ;;  %1534 = vmatmul.mubr.bf16.gmra.mxu0 %v1256_v55 }
 0x21a   : > { %v1154_v12 = vadd.f32 %v1153_v39, %v2462_v25  ;;  %v1224_v41 = vmax.f32 %v1152_v54, 0.0 }
 0x21b   : > { %v1157_v23 = vpop.f32.mrf.mxu1 }
 0x21c   : > { %v1225_v17 = vmax.f32 %v1154_v12, 0.0  ;;  %v1258_v46 = vpack.c.bf16 %v1224_v41, %v1222_v42  ;;  %v1158_v50 = vadd.f32 %v1157_v23, %v2466_v36 }
 0x21d   : > { %v1159_v44 = vpop.f32.mrf.mxu1 }
 0x21e   : > { %v1259_v26 = vpack.c.bf16 %v1225_v17, %v1223_v43  ;;  %v1160_v48 = vadd.f32 %v1159_v44, %v2462_v25  ;;  %v1226_v1 = vmax.f32 %v1158_v50, 0.0 }
 0x21f   : > { %v1161_v47 = vpop.f32.mrf.mxu1 }
 0x220   : > { %v1162_v49 = vadd.f32 %v1161_v47, %v2466_v36  ;;  %1541 = vmatprep.mubr.bf16.mxu0 %v1259_v26  ;;  %v1227_v63 = vmax.f32 %v1160_v48, 0.0 }
 0x221   : > { %v1163_v52 = vpop.f32.mrf.mxu1  ;;  %1542 = vmatmul.mubr.bf16.gmra.mxu0 %v1258_v46 }
 0x222   : > { %v1164_v53 = vadd.f32 %v1163_v52, %v2462_v25  ;;  %v1228_v57 = vmax.f32 %v1162_v49, 0.0 }
 0x224   : > { %v1229_v0 = vmax.f32 %v1164_v53, 0.0  ;;  %v1260_v2 = vpack.c.bf16 %v1228_v57, %v1226_v1 }
 0x226   : > { %v1261_v6 = vpack.c.bf16 %v1229_v0, %v1227_v63 }
 0x228   : > { %1549 = vmatprep.mubr.bf16.mxu0 %v1261_v6 }
 0x229   : > { %1550 = vmatmul.mubr.bf16.gmra.mxu0 %v1260_v2 }
 0x271   : > { %v1790_v31 = vpop.f32.mrf.mxu0 }
 0x273   : > { %v1791_v36 = vpop.f32.mrf.mxu0 }
 0x274   : > { %v1792_v3 = vadd.f32 %v1791_v36, %v1790_v31 }
 0x275   : > { %v1793_v45 = vpop.f32.mrf.mxu0 }
 0x276   : > { %v1432_v25 = vadd.f32 %v1792_v3, %v2535_v34 }
 0x277   : > { %v1794_v7 = vpop.f32.mrf.mxu0 }
 0x278   : > { %1985 = vtanh.f32 %v1432_v25  ;;  %v1795_v4 = vadd.f32 %v1794_v7, %v1793_v45 }
 0x279   : > { %v1796_v18 = vpop.f32.mrf.mxu0 }
 0x27a   : > { %v1435_v8 = vadd.f32 %v1795_v4, %v2535_v34 }
 0x27b   : > { %v1797_v10 = vpop.f32.mrf.mxu0 }
 0x27c   : > { %1987 = vtanh.f32 %v1435_v8  ;;  %v1798_v11 = vadd.f32 %v1797_v10, %v1796_v18 }
 0x27d   : > { %v1799_v13 = vpop.f32.mrf.mxu0 }
 0x27e   : > { %v1440_v62 = vadd.f32 %v1798_v11, %v2535_v34 }
 0x27f   : > { %v1800_v9 = vpop.f32.mrf.mxu0 }
 0x280   : > { %1989 = vtanh.f32 %v1440_v62  ;;  %v1801_v14 = vadd.f32 %v1800_v9, %v1799_v13 }
 0x281   : > { %v1802_v15 = vpop.f32.mrf.mxu0 }
 0x282   : > { %v1443_v19 = vadd.f32 %v1801_v14, %v2535_v34 }
 0x283   : > { %v1803_v61 = vpop.f32.mrf.mxu0 }
 0x284   : > { %1991 = vtanh.f32 %v1443_v19  ;;  %v1804_v16 = vadd.f32 %v1803_v61, %v1802_v15 }
 0x285   : > { %v1986_v20 = vpop.eup %1985  ;;  %v1805_v29 = vpop.f32.mrf.mxu0 }
 0x286   : > { %1590 = vst [vmem:[%s2545_s18] sm:$0xff] %v1986_v20  ;;  %v1448_v59 = vadd.f32 %v1804_v16, %v2535_v34 }
 0x287   : > { %v1806_v40 = vpop.f32.mrf.mxu0 }
 0x288   : > { %1993 = vtanh.f32 %v1448_v59  ;;  %v1807_v22 = vadd.f32 %v1806_v40, %v1805_v29 }
 0x289   : > { %v1988_v21 = vpop.eup %1987  ;;  %v1808_v24 = vpop.f32.mrf.mxu0 }
 0x28a   : > { %1591 = vst [vmem:[%s2545_s18 + $0x8] sm:$0xff] %v1988_v21  ;;  %v1451_v60 = vadd.f32 %v1807_v22, %v2535_v34 }
 0x28b   : > { %v1809_v58 = vpop.f32.mrf.mxu0 }
 0x28c   : > { %1995 = vtanh.f32 %v1451_v60  ;;  %v1810_v27 = vadd.f32 %v1809_v58, %v1808_v24 }
 0x28d   : > { %v1990_v28 = vpop.eup %1989  ;;  %v1811_v51 = vpop.f32.mrf.mxu0 }
 0x28e   : > { %1592 = vst [vmem:[%s2545_s18 + $0x10] sm:$0xff] %v1990_v28  ;;  %v1456_v5 = vadd.f32 %v1810_v27, %v2535_v34 }
 0x28f   : > { %v1812_v30 = vpop.f32.mrf.mxu0 }
 0x290   : > { %1997 = vtanh.f32 %v1456_v5  ;;  %v1813_v32 = vadd.f32 %v1812_v30, %v1811_v51 }
 0x291   : > { %v1992_v33 = vpop.eup %1991  ;;  %v1814_v35 = vpop.f32.mrf.mxu0 }
 0x292   : > { %1593 = vst [vmem:[%s2545_s18 + $0x18] sm:$0xff] %v1992_v33  ;;  %v1459_v55 = vadd.f32 %v1813_v32, %v2535_v34 }
 0x293   : > { %v1815_v37 = vpop.f32.mrf.mxu0 }
 0x294   : > { %1999 = vtanh.f32 %v1459_v55  ;;  %v1816_v38 = vadd.f32 %v1815_v37, %v1814_v35 }
 0x295   : > { %v1994_v54 = vpop.eup %1993  ;;  %v1817_v56 = vpop.f32.mrf.mxu0 }
 0x296   : > { %1594 = vst [vmem:[%s2545_s18 + $0x20] sm:$0xff] %v1994_v54  ;;  %v1464_v39 = vadd.f32 %v1816_v38, %v2535_v34 }
 0x297   : > { %v1818_v12 = vpop.f32.mrf.mxu0 }
 0x298   : > { %2001 = vtanh.f32 %v1464_v39  ;;  %v1819_v41 = vadd.f32 %v1818_v12, %v1817_v56 }
 0x299   : > { %v1996_v23 = vpop.eup %1995  ;;  %v1820_v43 = vpop.f32.mrf.mxu0 }
 0x29a   : > { %1595 = vst [vmem:[%s2545_s18 + $0x28] sm:$0xff] %v1996_v23  ;;  %v1467_v17 = vadd.f32 %v1819_v41, %v2535_v34 }
 0x29b   : > { %v1821_v42 = vpop.f32.mrf.mxu0 }
 0x29c   : > { %2003 = vtanh.f32 %v1467_v17  ;;  %v1822_v44 = vadd.f32 %v1821_v42, %v1820_v43 }
 0x29d   : > { %v1998_v26 = vpop.eup %1997  ;;  %v1823_v46 = vpop.f32.mrf.mxu0 }
 0x29e   : > { %1596 = vst [vmem:[%s2545_s18 + $0x30] sm:$0xff] %v1998_v26  ;;  %v1472_v47 = vadd.f32 %v1822_v44, %v2535_v34 }
 0x29f   : > { %v1824_v48 = vpop.f32.mrf.mxu0 }
 0x2a0   : > { %2005 = vtanh.f32 %v1472_v47  ;;  %v1825_v49 = vadd.f32 %v1824_v48, %v1823_v46 }
 0x2a1   : > { %v2000_v50 = vpop.eup %1999  ;;  %v1826_v52 = vpop.f32.mrf.mxu0 }
 0x2a2   : > { %1597 = vst [vmem:[%s2545_s18 + $0x38] sm:$0xff] %v2000_v50  ;;  %v1475_v53 = vadd.f32 %v1825_v49, %v2535_v34 }
 0x2a3   : > { %v1827_v57 = vpop.f32.mrf.mxu0 }
 0x2a4   : > { %2007 = vtanh.f32 %v1475_v53  ;;  %v1828_v63 = vadd.f32 %v1827_v57, %v1826_v52 }
 0x2a5   : > { %v2002_v0 = vpop.eup %2001  ;;  %v1829_v1 = vpop.f32.mrf.mxu0 }
 0x2a6   : > { %1598 = vst [vmem:[%s2545_s18 + $0x40] sm:$0xff] %v2002_v0  ;;  %v1480_v6 = vadd.f32 %v1828_v63, %v2535_v34 }
 0x2a7   : > { %v1830_v2 = vpop.f32.mrf.mxu0 }
 0x2a8   : > { %2009 = vtanh.f32 %v1480_v6  ;;  %v1831_v31 = vadd.f32 %v1830_v2, %v1829_v1 }
 0x2a9   : > { %v2004_v36 = vpop.eup %2003  ;;  %v1832_v3 = vpop.f32.mrf.mxu0 }
 0x2aa   : > { %1599 = vst [vmem:[%s2545_s18 + $0x48] sm:$0xff] %v2004_v36  ;;  %v1483_v45 = vadd.f32 %v1831_v31, %v2535_v34 }
 0x2ab   : > { %v1833_v25 = vpop.f32.mrf.mxu0 }
 0x2ac   : > { %2011 = vtanh.f32 %v1483_v45  ;;  %v1834_v7 = vadd.f32 %v1833_v25, %v1832_v3 }
 0x2ad   : > { %v2006_v4 = vpop.eup %2005  ;;  %v1835_v18 = vpop.f32.mrf.mxu0 }
 0x2ae   : > { %1600 = vst [vmem:[%s2545_s18 + $0x50] sm:$0xff] %v2006_v4  ;;  %v1488_v8 = vadd.f32 %v1834_v7, %v2535_v34 }
 0x2af   : > { %v1836_v10 = vpop.f32.mrf.mxu0 }
 0x2b0   : > { %2013 = vtanh.f32 %v1488_v8  ;;  %v1837_v11 = vadd.f32 %v1836_v10, %v1835_v18 }
 0x2b1   : > { %v2008_v13 = vpop.eup %2007  ;;  %v1838_v62 = vpop.f32.mrf.mxu0 }
 0x2b2   : > { %1601 = vst [vmem:[%s2545_s18 + $0x58] sm:$0xff] %v2008_v13  ;;  %v1491_v9 = vadd.f32 %v1837_v11, %v2535_v34 }
 0x2b3   : > { %v1839_v14 = vpop.f32.mrf.mxu0 }
 0x2b4   : > { %2015 = vtanh.f32 %v1491_v9  ;;  %v1840_v15 = vadd.f32 %v1839_v14, %v1838_v62 }
 0x2b5   : > { %v2010_v19 = vpop.eup %2009  ;;  %v1841_v61 = vpop.f32.mrf.mxu0 }
 0x2b6   : > { %1602 = vst [vmem:[%s2545_s18 + $0x60] sm:$0xff] %v2010_v19  ;;  %v1496_v16 = vadd.f32 %v1840_v15, %v2535_v34 }
 0x2b7   : > { %v1842_v20 = vpop.f32.mrf.mxu0 }
 0x2b8   : > { %2017 = vtanh.f32 %v1496_v16  ;;  %v1843_v29 = vadd.f32 %v1842_v20, %v1841_v61 }
 0x2b9   : > { %v2012_v59 = vpop.eup %2011  ;;  %v1844_v40 = vpop.f32.mrf.mxu0 }
 0x2ba   : > { %1603 = vst [vmem:[%s2545_s18 + $0x68] sm:$0xff] %v2012_v59  ;;  %v1499_v22 = vadd.f32 %v1843_v29, %v2535_v34 }
 0x2bb   : > { %v1845_v21 = vpop.f32.mrf.mxu0 }
 0x2bc   : > { %2019 = vtanh.f32 %v1499_v22  ;;  %v1846_v24 = vadd.f32 %v1845_v21, %v1844_v40 }
 0x2bd   : > { %v2014_v60 = vpop.eup %2013  ;;  %v1847_v58 = vpop.f32.mrf.mxu0 }
 0x2be   : > { %1604 = vst [vmem:[%s2545_s18 + $0x70] sm:$0xff] %v2014_v60  ;;  %v1504_v27 = vadd.f32 %v1846_v24, %v2535_v34 }
 0x2bf   : > { %v1848_v28 = vpop.f32.mrf.mxu0 }
 0x2c0   : > { %2021 = vtanh.f32 %v1504_v27  ;;  %v1849_v51 = vadd.f32 %v1848_v28, %v1847_v58 }
 0x2c1   : > { %v2016_v5 = vpop.eup %2015  ;;  %v1850_v30 = vpop.f32.mrf.mxu0 }
 0x2c2   : > { %1605 = vst [vmem:[%s2545_s18 + $0x78] sm:$0xff] %v2016_v5  ;;  %v1507_v32 = vadd.f32 %v1849_v51, %v2535_v34 }
 0x2c3   : > { %v1851_v33 = vpop.f32.mrf.mxu0 }
 0x2c4   : > { %2023 = vtanh.f32 %v1507_v32  ;;  %v1852_v35 = vadd.f32 %v1851_v33, %v1850_v30 }
 0x2c5   : > { %v2018_v55 = vpop.eup %2017  ;;  %v1853_v37 = vpop.f32.mrf.mxu0 }
 0x2c6   : > { %1606 = vst [vmem:[%s2545_s18 + $0x80] sm:$0xff] %v2018_v55  ;;  %v1512_v38 = vadd.f32 %v1852_v35, %v2535_v34 }
 0x2c7   : > { %v1854_v54 = vpop.f32.mrf.mxu0 }
 0x2c8   : > { %2025 = vtanh.f32 %v1512_v38  ;;  %v1855_v56 = vadd.f32 %v1854_v54, %v1853_v37 }
 0x2c9   : > { %v2020_v39 = vpop.eup %2019  ;;  %v1856_v12 = vpop.f32.mrf.mxu0 }
 0x2ca   : > { %1607 = vst [vmem:[%s2545_s18 + $0x88] sm:$0xff] %v2020_v39  ;;  %v1515_v41 = vadd.f32 %v1855_v56, %v2535_v34 }
 0x2cb   : > { %v1857_v23 = vpop.f32.mrf.mxu0 }
 0x2cc   : > { %2027 = vtanh.f32 %v1515_v41  ;;  %v1858_v43 = vadd.f32 %v1857_v23, %v1856_v12 }
 0x2cd   : > { %v2022_v17 = vpop.eup %2021  ;;  %v1859_v42 = vpop.f32.mrf.mxu0 }
 0x2ce   : > { %1608 = vst [vmem:[%s2545_s18 + $0x90] sm:$0xff] %v2022_v17  ;;  %v1520_v44 = vadd.f32 %v1858_v43, %v2535_v34 }
 0x2cf   : > { %v1860_v26 = vpop.f32.mrf.mxu0 }
 0x2d0   : > { %2029 = vtanh.f32 %v1520_v44  ;;  %v1861_v46 = vadd.f32 %v1860_v26, %v1859_v42 }
 0x2d1   : > { %v2024_v47 = vpop.eup %2023  ;;  %v1862_v48 = vpop.f32.mrf.mxu0 }
 0x2d2   : > { %1609 = vst [vmem:[%s2545_s18 + $0x98] sm:$0xff] %v2024_v47  ;;  %v1523_v49 = vadd.f32 %v1861_v46, %v2535_v34 }
 0x2d3   : > { %v1863_v50 = vpop.f32.mrf.mxu0 }
 0x2d4   : > { %2031 = vtanh.f32 %v1523_v49  ;;  %v1864_v52 = vadd.f32 %v1863_v50, %v1862_v48 }
 0x2d5   : > { %v2026_v53 = vpop.eup %2025  ;;  %v1865_v57 = vpop.f32.mrf.mxu0 }
 0x2d6   : > { %1610 = vst [vmem:[%s2545_s18 + $0xa0] sm:$0xff] %v2026_v53  ;;  %v1528_v63 = vadd.f32 %v1864_v52, %v2535_v34 }
 0x2d7   : > { %v1866_v0 = vpop.f32.mrf.mxu0 }
 0x2d8   : > { %2033 = vtanh.f32 %v1528_v63  ;;  %v1867_v1 = vadd.f32 %v1866_v0, %v1865_v57 }
 0x2d9   : > { %v2028_v6 = vpop.eup %2027  ;;  %v1868_v2 = vpop.f32.mrf.mxu0 }
 0x2da   : > { %1611 = vst [vmem:[%s2545_s18 + $0xa8] sm:$0xff] %v2028_v6  ;;  %v1531_v31 = vadd.f32 %v1867_v1, %v2535_v34 }
 0x2db   : > { %v1869_v36 = vpop.f32.mrf.mxu0 }
 0x2dc   : > { %2035 = vtanh.f32 %v1531_v31  ;;  %v1870_v3 = vadd.f32 %v1869_v36, %v1868_v2 }
 0x2dd   : > { %v2030_v45 = vpop.eup %2029  ;;  %v1871_v25 = vpop.f32.mrf.mxu0 }
 0x2de   : > { %1612 = vst [vmem:[%s2545_s18 + $0xb0] sm:$0xff] %v2030_v45  ;;  %v1536_v7 = vadd.f32 %v1870_v3, %v2535_v34 }
 0x2df   : > { %v1872_v4 = vpop.f32.mrf.mxu0 }
 0x2e0   : > { %2037 = vtanh.f32 %v1536_v7  ;;  %v1873_v18 = vadd.f32 %v1872_v4, %v1871_v25 }
 0x2e1   : > { %v2032_v8 = vpop.eup %2031  ;;  %v1874_v10 = vpop.f32.mrf.mxu0 }
 0x2e2   : > { %1613 = vst [vmem:[%s2545_s18 + $0xb8] sm:$0xff] %v2032_v8  ;;  %v1539_v11 = vadd.f32 %v1873_v18, %v2535_v34 }
 0x2e3   : > { %v1875_v13 = vpop.f32.mrf.mxu0 }
 0x2e4   : > { %2039 = vtanh.f32 %v1539_v11  ;;  %v1876_v62 = vadd.f32 %v1875_v13, %v1874_v10 }
 0x2e5   : > { %v2034_v9 = vpop.eup %2033  ;;  %v1877_v14 = vpop.f32.mrf.mxu0 }
 0x2e6   : > { %1614 = vst [vmem:[%s2545_s18 + $0xc0] sm:$0xff] %v2034_v9  ;;  %v1544_v15 = vadd.f32 %v1876_v62, %v2535_v34 }
 0x2e7   : > { %v1878_v19 = vpop.f32.mrf.mxu0 }
 0x2e8   : > { %2041 = vtanh.f32 %v1544_v15  ;;  %v1879_v61 = vadd.f32 %v1878_v19, %v1877_v14 }
 0x2e9   : > { %v2036_v16 = vpop.eup %2035  ;;  %v1880_v20 = vpop.f32.mrf.mxu0 }
 0x2ea   : > { %1615 = vst [vmem:[%s2545_s18 + $0xc8] sm:$0xff] %v2036_v16  ;;  %v1547_v29 = vadd.f32 %v1879_v61, %v2535_v34 }
 0x2eb   : > { %v1881_v59 = vpop.f32.mrf.mxu0 }
 0x2ec   : > { %2043 = vtanh.f32 %v1547_v29  ;;  %v1882_v40 = vadd.f32 %v1881_v59, %v1880_v20 }
 0x2ed   : > { %v2038_v22 = vpop.eup %2037  ;;  %v1883_v21 = vpop.f32.mrf.mxu0 }
 0x2ee   : > { %1616 = vst [vmem:[%s2545_s18 + $0xd0] sm:$0xff] %v2038_v22  ;;  %v1552_v24 = vadd.f32 %v1882_v40, %v2535_v34 }
 0x2ef   : > { %v1884_v60 = vpop.f32.mrf.mxu0 }
 0x2f0   : > { %2045 = vtanh.f32 %v1552_v24  ;;  %v1885_v58 = vadd.f32 %v1884_v60, %v1883_v21 }
 0x2f1   : > { %v2040_v27 = vpop.eup %2039 }
 0x2f2   : > { %1617 = vst [vmem:[%s2545_s18 + $0xd8] sm:$0xff] %v2040_v27  ;;  %v1555_v28 = vadd.f32 %v1885_v58, %v2535_v34 }
 0x2f4   : > { %2047 = vtanh.f32 %v1555_v28 }
 0x2f5   : > { %v2042_v51 = vpop.eup %2041 }
 0x2f6   : > { %1618 = vst [vmem:[%s2545_s18 + $0xe0] sm:$0xff] %v2042_v51 }
 0x2f9   : > { %v2044_v5 = vpop.eup %2043 }
 0x2fa   : > { %1619 = vst [vmem:[%s2545_s18 + $0xe8] sm:$0xff] %v2044_v5 }
 0x2fd   : > { %v2046_v30 = vpop.eup %2045 }
 0x2fe   : > { %1620 = vst [vmem:[%s2545_s18 + $0xf0] sm:$0xff] %v2046_v30 }
 0x301   : > { %v2048_v32 = vpop.eup %2047 }
 0x302   : > { %1621 = vst [vmem:[%s2545_s18 + $0xf8] sm:$0xff] %v2048_v32 }
 0x303 PF: > { %s17_s24 = sadd.s32 1, %s2055_s24  }
 0x304   : > { %p14_p4 = scmp.ge.s32.totalorder %s17_s24, 4  }
 0x306   :  { %16 = sbr.rel (!%p14_p4) target bundleno = 1 (0x1), region = 78 }

</bundles_post_ra>
